<compile_context>
chip_gen: v5e
topology: v5e:2x2
jax: 0.10.0
libtpu: 0.0.40
codegen_flags: <defaults>
</compile_context>

<pallas_src>
import math

import jax
import jax.numpy as jnp
from jax.experimental import pallas as pl
from jax.experimental.pallas import tpu as pltpu

IN_F, H1_F, H2_F, OUT_F = 2, 8, 4, 1

# Column layout of the packed (8, 128) parameter slab (all f32):
#   [:, 0:2]   w1      (8, 2)
#   [:, 2:3]   b1      (8, 1)
#   [:, 3:7]   w2^T    (8, 4)
#   [0:4, 7:8] b2      (4, 1)
#   [0:4, 8:9] w3^T    (4, 1)
#   [0:1, 9:10] b3     (1, 1)


def mlp_kernel(x_ref, p_ref, o_ref):
    xt = x_ref[...]                       # (2, T) f32, batch in lanes

    w1 = p_ref[:, 0:2]                    # (8, 2)
    b1 = p_ref[:, 2:3]                    # (8, 1)
    w2t = p_ref[:, 3:7]                   # (8, 4)  (= W2^T)
    b2 = p_ref[0:4, 7:8]                  # (4, 1)
    w3t = p_ref[0:4, 8:9]                 # (4, 1)  (= W3^T)
    b3 = p_ref[0:1, 9:10]                 # (1, 1)

    # ---- Layer 1: (8, T) full-sublane accumulator, 2 unrolled FMAs (VPU),
    #      tanh on the EUP.
    h1 = jnp.tanh(b1 + w1[:, 0:1] * xt[0:1, :] + w1[:, 1:2] * xt[1:2, :])

    # ---- Layer 2: per output, full-vreg multiply (8 sublanes used) followed
    #      by a sublane reduction on the XLU; assemble (4, T) and tanh once.
    rows = []
    for o in range(H2_F):
        z = jnp.sum(w2t[:, o:o + 1] * h1, axis=0, keepdims=True)   # (1, T)
        rows.append(z + b2[o:o + 1, :])
    h2 = jnp.tanh(jnp.concatenate(rows, axis=0))                    # (4, T)

    # ---- Layer 3: single multiply + 4-sublane reduction.
    out = jnp.sum(w3t * h2, axis=0, keepdims=True) + b3             # (1, T)

    o_ref[...] = out.astype(o_ref.dtype)                            # lane-dense


def _round_up(n, m):
    return ((n + m - 1) // m) * m


def _pack_params(params):
    """Pack (w1,b1,w2,b2,w3,b3) into one VMEM-resident (8, 128) f32 slab."""
    w1, b1, w2, b2, w3, b3 = [p.astype(jnp.float32) for p in params]
    slab = jnp.zeros((8, 128), jnp.float32)
    slab = slab.at[:, 0:2].set(w1)
    slab = slab.at[:, 2:3].set(b1)
    slab = slab.at[:, 3:7].set(w2.T)
    slab = slab.at[0:4, 7:8].set(b2)
    slab = slab.at[0:4, 8:9].set(w3.T)
    slab = slab.at[0:1, 9:10].set(b3)
    return slab


def _forward_t(xt, params, *, batch, max_tile=32768):
    """Core entry: xt is (2, b128) f32 with b128 a multiple of 128 (batch in
    lanes).  Call this directly with a pre-transposed input to skip the
    wrapper-side HBM transpose."""
    b128 = xt.shape[1]
    assert b128 % 128 == 0 and xt.shape[0] == IN_F

    # Tile: as large as possible (amortise ~0.35us/step grid overhead), but
    # guarantee >= 2 grid steps when there is enough work so the "parallel"
    # grid axis can split across the two v7x TensorCores.
    tile = min(_round_up(max_tile, 128), b128)
    if b128 >= 2 * 128 and pl.cdiv(b128, tile) < 2:
        tile = _round_up(b128 // 2, 128)
    grid = (pl.cdiv(b128, tile),)         # no padding to a tile multiple

    slab = _pack_params(params)

    out_t = pl.pallas_call(
        mlp_kernel,
        out_shape=jax.ShapeDtypeStruct((OUT_F, b128), jnp.float32),
        grid=grid,
        in_specs=[
            pl.BlockSpec((IN_F, tile), lambda i: (0, i)),   # x tile (pipelined)
            pl.BlockSpec((8, 128), lambda i: (0, 0)),       # param slab (resident)
        ],
        out_specs=pl.BlockSpec((OUT_F, tile), lambda i: (0, i)),
        compiler_params=pltpu.CompilerParams(
            dimension_semantics=("parallel",),              # v7x megacore split
        ),
    )(xt, slab)

    # Reshape-style view of the result (no output transpose pass).
    return out_t[0, :batch][:, None]                         # (B, 1)


def function_approximation_forward(x, params, *, max_tile=32768):
    """Module-facing API: x is (B, 2) f32, returns (B, 1).

    Does one wrapper-side transpose+pad of x to the (2, b128) batch-in-lanes
    layout (an extra HBM pass over x); producers holding x already transposed
    can call `_forward_t` directly and avoid it.
    """
    B = x.shape[0]
    b128 = _round_up(B, 128)
    if B == b128:
        xt = x.T.astype(jnp.float32)
    else:
        xt = jnp.zeros((IN_F, b128), jnp.float32).at[:, :B].set(x.T)
    return _forward_t(xt, params, batch=B, max_tile=max_tile)


def init_params(key):
    """PyTorch nn.Linear-style init: U[-1/sqrt(fan_in), 1/sqrt(fan_in)].

    Weights stored (out_features, in_features) like PyTorch; biases stored as
    (out_features, 1) columns."""
    dims = [(IN_F, H1_F), (H1_F, H2_F), (H2_F, OUT_F)]
    params = []
    for fan_in, fan_out in dims:
        key, kw, kb = jax.random.split(key, 3)
        bound = 1.0 / math.sqrt(fan_in)
        w = jax.random.uniform(kw, (fan_out, fan_in), jnp.float32, -bound, bound)
        b = jax.random.uniform(kb, (fan_out, 1), jnp.float32, -bound, bound)
        params.extend([w, b])
    return tuple(params)


def reference_forward(x, params):
    w1, b1, w2, b2, w3, b3 = params
    h1 = jnp.tanh(x @ w1.T + b1.T)
    h2 = jnp.tanh(h1 @ w2.T + b2.T)
    return h2 @ w3.T + b3.T


if __name__ == "__main__":
    key = jax.random.PRNGKey(0)
    key, kx1, kx2 = jax.random.split(key, 3)
    params = init_params(key)

    # Small batch (single grid step).
    batch = 8
    x = jax.random.normal(kx1, (batch, IN_F), jnp.float32)
    out = jax.block_until_ready(function_approximation_forward(x, params))
    ref = reference_forward(x, params)
    assert out.shape == (batch, 1), out.shape
    assert jnp.allclose(out, ref, atol=1e-5, rtol=1e-5), (out, ref)

    # Batch that forces a 2-step grid with a ragged last block (exercises the
    # cdiv grid / boundary-block padding and the v7x two-core split path).
    batch2 = 384
    x2 = jax.random.normal(kx2, (batch2, IN_F), jnp.float32)
    out2 = jax.block_until_ready(function_approximation_forward(x2, params))
    ref2 = reference_forward(x2, params)
    assert out2.shape == (batch2, 1), out2.shape
    assert jnp.allclose(out2, ref2, atol=1e-5, rtol=1e-5)

    print("KERNEL_OK")
</pallas_src>

<mosaic_0001>
module attributes {stable_mosaic.version = 11 : i64} {
  func.func @mlp_kernel(%arg0: i32, %arg1: memref<2x128xf32, #tpu.memory_space<vmem>>, %arg2: memref<8x128xf32, #tpu.memory_space<vmem>>, %arg3: memref<1x128xf32, #tpu.memory_space<vmem>>) attributes {dimension_semantics = [#tpu.dimension_semantics<parallel>], iteration_bounds = array<i64: 1>, scalar_prefetch = 0 : i64, scratch_operands = 0 : i64, tpu.core_type = #tpu.core_type<tc>, window_params = [{transform_indices = @transform_0, window_bounds = array<i64: 2, 128>}, {pipeline_mode = #tpu.pipeline_mode<synchronous>, transform_indices = @transform_1, window_bounds = array<i64: 8, 128>}, {transform_indices = @transform_2, window_bounds = array<i64: 1, 128>}]} {
    %c0 = arith.constant 0 : index
    %c0_0 = arith.constant 0 : index
    %0 = vector.load %arg1[%c0, %c0_0] : memref<2x128xf32, #tpu.memory_space<vmem>>, vector<2x128xf32>
    %c0_1 = arith.constant 0 : index
    %c0_2 = arith.constant 0 : index
    %1 = vector.load %arg2[%c0_1, %c0_2] : memref<8x128xf32, #tpu.memory_space<vmem>>, vector<8x2xf32>
    %c0_3 = arith.constant 0 : index
    %c2 = arith.constant 2 : index
    %2 = vector.load %arg2[%c0_3, %c2] : memref<8x128xf32, #tpu.memory_space<vmem>>, vector<8x1xf32>
    %c0_4 = arith.constant 0 : index
    %c3 = arith.constant 3 : index
    %3 = vector.load %arg2[%c0_4, %c3] : memref<8x128xf32, #tpu.memory_space<vmem>>, vector<8x4xf32>
    %c0_5 = arith.constant 0 : index
    %c7 = arith.constant 7 : index
    %4 = vector.load %arg2[%c0_5, %c7] : memref<8x128xf32, #tpu.memory_space<vmem>>, vector<4x1xf32>
    %c0_6 = arith.constant 0 : index
    %c8 = arith.constant 8 : index
    %5 = vector.load %arg2[%c0_6, %c8] : memref<8x128xf32, #tpu.memory_space<vmem>>, vector<4x1xf32>
    %c0_7 = arith.constant 0 : index
    %c9 = arith.constant 9 : index
    %6 = vector.load %arg2[%c0_7, %c9] : memref<8x128xf32, #tpu.memory_space<vmem>>, vector<1x1xf32>
    %7 = vector.extract_strided_slice %1 {offsets = [0, 0], sizes = [8, 1], strides = [1, 1]} : vector<8x2xf32> to vector<8x1xf32>
    %8 = vector.extract_strided_slice %0 {offsets = [0, 0], sizes = [1, 128], strides = [1, 1]} : vector<2x128xf32> to vector<1x128xf32>
    %9 = vector.broadcast %7 : vector<8x1xf32> to vector<8x128xf32>
    %10 = vector.broadcast %8 : vector<1x128xf32> to vector<8x128xf32>
    %11 = arith.mulf %9, %10 : vector<8x128xf32>
    %12 = vector.broadcast %2 : vector<8x1xf32> to vector<8x128xf32>
    %13 = arith.addf %12, %11 : vector<8x128xf32>
    %14 = vector.extract_strided_slice %1 {offsets = [0, 1], sizes = [8, 1], strides = [1, 1]} : vector<8x2xf32> to vector<8x1xf32>
    %15 = vector.extract_strided_slice %0 {offsets = [1, 0], sizes = [1, 128], strides = [1, 1]} : vector<2x128xf32> to vector<1x128xf32>
    %16 = vector.broadcast %14 : vector<8x1xf32> to vector<8x128xf32>
    %17 = vector.broadcast %15 : vector<1x128xf32> to vector<8x128xf32>
    %18 = arith.mulf %16, %17 : vector<8x128xf32>
    %19 = arith.addf %13, %18 : vector<8x128xf32>
    %20 = math.tanh %19 : vector<8x128xf32>
    %21 = vector.extract_strided_slice %3 {offsets = [0, 0], sizes = [8, 1], strides = [1, 1]} : vector<8x4xf32> to vector<8x1xf32>
    %22 = vector.broadcast %21 : vector<8x1xf32> to vector<8x128xf32>
    %23 = arith.mulf %22, %20 : vector<8x128xf32>
    %cst = arith.constant dense<0.000000e+00> : vector<128xf32>
    %24 = vector.multi_reduction <add>, %23, %cst [0] : vector<8x128xf32> to vector<128xf32>
    %25 = vector.shape_cast %24 : vector<128xf32> to vector<1x128xf32>
    %26 = vector.extract_strided_slice %4 {offsets = [0, 0], sizes = [1, 1], strides = [1, 1]} : vector<4x1xf32> to vector<1x1xf32>
    %27 = vector.broadcast %26 : vector<1x1xf32> to vector<1x128xf32>
    %28 = arith.addf %25, %27 : vector<1x128xf32>
    %29 = vector.extract_strided_slice %3 {offsets = [0, 1], sizes = [8, 1], strides = [1, 1]} : vector<8x4xf32> to vector<8x1xf32>
    %30 = vector.broadcast %29 : vector<8x1xf32> to vector<8x128xf32>
    %31 = arith.mulf %30, %20 : vector<8x128xf32>
    %cst_8 = arith.constant dense<0.000000e+00> : vector<128xf32>
    %32 = vector.multi_reduction <add>, %31, %cst_8 [0] : vector<8x128xf32> to vector<128xf32>
    %33 = vector.shape_cast %32 : vector<128xf32> to vector<1x128xf32>
    %34 = vector.extract_strided_slice %4 {offsets = [1, 0], sizes = [1, 1], strides = [1, 1]} : vector<4x1xf32> to vector<1x1xf32>
    %35 = vector.broadcast %34 : vector<1x1xf32> to vector<1x128xf32>
    %36 = arith.addf %33, %35 : vector<1x128xf32>
    %37 = vector.extract_strided_slice %3 {offsets = [0, 2], sizes = [8, 1], strides = [1, 1]} : vector<8x4xf32> to vector<8x1xf32>
    %38 = vector.broadcast %37 : vector<8x1xf32> to vector<8x128xf32>
    %39 = arith.mulf %38, %20 : vector<8x128xf32>
    %cst_9 = arith.constant dense<0.000000e+00> : vector<128xf32>
    %40 = vector.multi_reduction <add>, %39, %cst_9 [0] : vector<8x128xf32> to vector<128xf32>
    %41 = vector.shape_cast %40 : vector<128xf32> to vector<1x128xf32>
    %42 = vector.extract_strided_slice %4 {offsets = [2, 0], sizes = [1, 1], strides = [1, 1]} : vector<4x1xf32> to vector<1x1xf32>
    %43 = vector.broadcast %42 : vector<1x1xf32> to vector<1x128xf32>
    %44 = arith.addf %41, %43 : vector<1x128xf32>
    %45 = vector.extract_strided_slice %3 {offsets = [0, 3], sizes = [8, 1], strides = [1, 1]} : vector<8x4xf32> to vector<8x1xf32>
    %46 = vector.broadcast %45 : vector<8x1xf32> to vector<8x128xf32>
    %47 = arith.mulf %46, %20 : vector<8x128xf32>
    %cst_10 = arith.constant dense<0.000000e+00> : vector<128xf32>
    %48 = vector.multi_reduction <add>, %47, %cst_10 [0] : vector<8x128xf32> to vector<128xf32>
    %49 = vector.shape_cast %48 : vector<128xf32> to vector<1x128xf32>
    %50 = vector.extract_strided_slice %4 {offsets = [3, 0], sizes = [1, 1], strides = [1, 1]} : vector<4x1xf32> to vector<1x1xf32>
    %51 = vector.broadcast %50 : vector<1x1xf32> to vector<1x128xf32>
    %52 = arith.addf %49, %51 : vector<1x128xf32>
    %53 = tpu.concatenate %28, %36, %44, %52 in 0 : vector<1x128xf32>, vector<1x128xf32>, vector<1x128xf32>, vector<1x128xf32> -> vector<4x128xf32>
    %54 = math.tanh %53 : vector<4x128xf32>
    %55 = vector.broadcast %5 : vector<4x1xf32> to vector<4x128xf32>
    %56 = arith.mulf %55, %54 : vector<4x128xf32>
    %cst_11 = arith.constant dense<0.000000e+00> : vector<128xf32>
    %57 = vector.multi_reduction <add>, %56, %cst_11 [0] : vector<4x128xf32> to vector<128xf32>
    %58 = vector.shape_cast %57 : vector<128xf32> to vector<1x128xf32>
    %59 = vector.broadcast %6 : vector<1x1xf32> to vector<1x128xf32>
    %60 = arith.addf %58, %59 : vector<1x128xf32>
    %c0_12 = arith.constant 0 : index
    %c0_13 = arith.constant 0 : index
    %61 = vector.load %arg3[%c0_12, %c0_13] : memref<1x128xf32, #tpu.memory_space<vmem>>, vector<1x128xf32>
    tpu.vector_store %arg3[%c0_12, %c0_13], %60 {strides = array<i32>} : memref<1x128xf32, #tpu.memory_space<vmem>>, vector<1x128xf32>,
    return
  }
  func.func @transform_0(%arg0: i32) -> (i32, i32) {
    %c0_i32 = arith.constant 0 : i32
    %c0_i32_0 = arith.constant 0 : i32
    return %c0_i32, %arg0 : i32, i32
  }
  func.func @transform_1(%arg0: i32) -> (i32, i32) {
    %c0_i32 = arith.constant 0 : i32
    %c0_i32_0 = arith.constant 0 : i32
    %c0_i32_1 = arith.constant 0 : i32
    return %c0_i32, %c0_i32_0 : i32, i32
  }
  func.func @transform_2(%arg0: i32) -> (i32, i32) {
    %c0_i32 = arith.constant 0 : i32
    %c0_i32_0 = arith.constant 0 : i32
    return %c0_i32, %arg0 : i32, i32
  }
}

</mosaic_0001>

<bundles_post_ra>
// kernel: tpu_custom_call.1
= control target key start
LH: loop header
LB: loop body
LE: loop exit
PB: predicated region body
PF: predicated region fallthrough
CT: control target
= control target key end

     0   :  { %7 = vsyncpa [#allocation3], 0  ;;  %s305_s0 = inlined_call_operand.hbm [shape: f32[2,128], index: 0, kind: input, shape index: {}]   ;;  %s306_s1 = inlined_call_operand.hbm [shape: f32[8,128], index: 1, kind: input, shape index: {}]   ;;  %s307_s2 = inlined_call_operand.hbm [shape: f32[1,128], index: 2, kind: output, shape index: {}]  }
   0x1   :  { %8 = vsyncpa [#allocation6], 0 }
   0x2   :  { %9 = vsyncpa [#allocation4], 0  ;;  %s15_s11 = sshll.u32 %s305_s0, 4  ;;  %s268_s12 = smov [#allocation2]   ;;  %s16_s11 = int_to_ptr.hbm [resolvable:$true] %s15_s11 }
   0x3   :  { %s17_s13 = sshll.u32 %s268_s12, 4  ;;  %s26_s16 = sshll.u32 %s306_s1, 4  ;;  %s18_s13 = int_to_ptr.vmem [resolvable:$true] %s17_s13  ;;  %s27_s16 = int_to_ptr.hbm [resolvable:$true] %s26_s16 }
   0x4   :  { %20 = dma.hbm_to_vmem [thread:$0]  %s16_s11, 32, %s18_s13, [#allocation3]  }
   0x5   :  { %s269_s17 = smov [#allocation5]  }
   0x6   :  { %s28_s18 = sshll.u32 %s269_s17, 4  ;;  %s29_s18 = int_to_ptr.vmem [resolvable:$true] %s28_s18 }
   0x7   :  { %31 = dma.hbm_to_vmem [thread:$0]  %s27_s16, 128, %s29_s18, [#allocation6]  }
   0x8   :  { %262 = dma.done.wait [#allocation3], 32  }
   0x9   :  { %263 = vsyncadd [#allocation3], 4294967264 }
   0xa   :  { %264 = dma.done.wait [#allocation6], 128  }
   0xb   :  { %265 = vsyncadd [#allocation6], 4294967168  ;;  %v270_v0 = vmov 0   ;;  %v271_v1 = vmov 1   ;;  %v272_v2 = vmov 4   ;;  %v41_v3 = vld [vmem:[#allocation5] sm:$0xff] }
   0xc   :  { %175 = vset.pattern.permute.xlu0 %v270_v0  ;;  %177 = vset.pattern.permute.xlu1 %v271_v1  ;;  %v273_v4 = vmov 2   ;;  %v274_v5 = vmov 3   ;;  %v275_v6 = vmov 5   ;;  %v42_v7 = vld [vmem:[#allocation5] sm:$0xf]  ;;  %v276_v8 = vmov 6  }
   0xd   :  { %179 = vset.pattern.permute.xlu2 %v272_v2  ;;  %46 = vperm.xlu0 %175, %v41_v3   ;;  %v277_v9 = vmov 8   ;;  %v278_v10 = vmov 7   ;;  %v43_v11 = vld [vmem:[#allocation5] sm:$0x1]  ;;  %v279_v12 = vmov 9   ;;  %vm117_vm0 = vcmask 1040384  }
   0xe   :  { %57 = vperm.xlu1 %177, %v41_v3   ;;  %82 = vperm.xlu2 %179, %v41_v3   ;;  %v40_v15 = vld [vmem:[#allocation2] sm:$0x3]  ;;  %vm119_vm1 = vcmask 1041408   ;;  %vm121_vm2 = vcmask 1042432   ;;  %vm129_vm3 = vcmask 1043456   ;;  %s280_s0 = smov [#allocation7]  }
   0xf   :  { %v49_v16 = vperm.slane %v40_v15, 0  ;;  %v60_v17 = vperm.slane %v40_v15, 1  ;;  %s149_s1 = sshll.u32 %s280_s0, 4  ;;  %s151_s21 = sshll.u32 %s307_s2, 4  ;;  %s150_s1 = int_to_ptr.vmem [resolvable:$true] %s149_s1  ;;  %s152_s21 = int_to_ptr.hbm [resolvable:$true] %s151_s21 }
  0x15   :  { %176 = vset.pattern.permute.xlu0 %v273_v4 }
  0x16   :  { %178 = vset.pattern.permute.xlu1 %v274_v5  ;;  %52 = vperm.xlu0 %176, %v41_v3  }
  0x17   :  { %65 = vperm.xlu1 %178, %v41_v3   ;;  %180 = vset.pattern.permute.xlu2 %v275_v6 }
  0x18   :  { %94 = vperm.xlu2 %180, %v41_v3  }
  0x1e   :  { %183 = vset.pattern.permute.xlu0 %v277_v9 }
  0x1f   :  { %181 = vset.pattern.permute.xlu1 %v276_v8  ;;  %125 = vperm.xlu0 %183, %v42_v7  }
  0x20   :  { %106 = vperm.xlu1 %181, %v41_v3   ;;  %182 = vset.pattern.permute.xlu2 %v278_v10 }
  0x21   :  { %77 = vperm.xlu2 %182, %v42_v7  }
  0x27   :  { %185 = vset.pattern.permute.xlu0 %v279_v12 }
  0x28   :  { %184 = vset.pattern.permute.xlu1 %v279_v12 }
  0x29   :  { %139 = vperm.xlu1 %184, %v43_v11  }
  0x68   :  { %v83_v19 = vpop.permute.xlu2 %82 }
  0x72   :  { %v95_v25 = vpop.permute.xlu2 %94 }
  0x7b   :  { %v78_v52 = vpop.permute.xlu2 %77 }
  0x7f   :  { %v47_v13 = vpop.permute.xlu0 %46 }
  0x80   :  { %v58_v14 = vpop.permute.xlu1 %57  ;;  %v50_v18 = vmul.f32 %v49_v16, %v47_v13 }
  0x81   :  { %v61_v22 = vmul.f32 %v60_v17, %v58_v14 }
  0x88   :  { %v53_v20 = vpop.permute.xlu0 %52 }
  0x89   :  { %v66_v21 = vpop.permute.xlu1 %65  ;;  %v55_v23 = vadd.f32 %v53_v20, %v50_v18 }
  0x8b   :  { %v62_v24 = vadd.f32 %v61_v22, %v55_v23 }
  0x8d   :  { %186 = vtanh.f32 %v62_v24 }
  0x91   :  { %v126_v0 = vpop.permute.xlu0 %125 }
  0x92   :  { %v107_v26 = vpop.permute.xlu1 %106 }
  0x93   :  { %v187_v27 = vpop.eup %186 }
  0x94   :  { %v85_v28 = vmul.f32 %v187_v27, %v83_v19  ;;  %v68_v29 = vmul.f32 %v187_v27, %v66_v21  ;;  %v97_v30 = vmul.f32 %v187_v27, %v95_v25  ;;  %v109_v31 = vmul.f32 %v187_v27, %v107_v26 }
  0x96   :  { %v86_v32 = vrot.slane %v85_v28, 4  ;;  %v69_v33 = vrot.slane %v68_v29, 4  ;;  %v98_v34 = vrot.slane %v97_v30, 4  ;;  %v110_v35 = vrot.slane %v109_v31, 4 }
  0x98   :  { %v87_v36 = vadd.f32 %v86_v32, %v85_v28  ;;  %v70_v37 = vadd.f32 %v69_v33, %v68_v29  ;;  %v99_v38 = vadd.f32 %v98_v34, %v97_v30  ;;  %v111_v39 = vadd.f32 %v110_v35, %v109_v31 }
  0x9a   :  { %v88_v40 = vrot.slane %v87_v36, 2  ;;  %v71_v41 = vrot.slane %v70_v37, 2  ;;  %v100_v42 = vrot.slane %v99_v38, 2  ;;  %v112_v43 = vrot.slane %v111_v39, 2 }
  0x9b   :  { %v140_v9 = vpop.permute.xlu1 %139 }
  0x9c   :  { %v89_v44 = vadd.f32 %v88_v40, %v87_v36  ;;  %v72_v45 = vadd.f32 %v71_v41, %v70_v37  ;;  %v101_v46 = vadd.f32 %v100_v42, %v99_v38  ;;  %v113_v47 = vadd.f32 %v112_v43, %v111_v39 }
  0x9e   :  { %v90_v48 = vrot.slane %v89_v44, 1  ;;  %v73_v49 = vrot.slane %v72_v45, 1  ;;  %v102_v50 = vrot.slane %v101_v46, 1  ;;  %v114_v51 = vrot.slane %v113_v47, 1 }
  0xa0   :  { %v74_v53 = vadd.f32 %v73_v49, %v72_v45  ;;  %v91_v54 = vadd.f32 %v90_v48, %v89_v44  ;;  %v103_v55 = vadd.f32 %v102_v50, %v101_v46  ;;  %v115_v56 = vadd.f32 %v114_v51, %v113_v47 }
  0xa2   :  { %v80_v57 = vadd.f32 %v78_v52, %v74_v53  ;;  %v92_v58 = vadd.f32 %v91_v54, %v78_v52  ;;  %v104_v59 = vadd.f32 %v103_v55, %v78_v52  ;;  %v116_v60 = vadd.f32 %v115_v56, %v78_v52 }
  0xa4   :  { %v118_v61 = vsel %vm117_vm0, %v80_v57, %v92_v58 }
  0xa5   :  { %v120_v62 = vsel %vm119_vm1, %v118_v61, %v104_v59 }
  0xa6   :  { %v122_v63 = vsel %vm121_vm2, %v120_v62, %v116_v60 }
  0xa7   :  { %188 = vtanh.f32 %v122_v63 }
  0xad   :  { %v189_v1 = vpop.eup %188 }
  0xae   :  { %v128_v2 = vmul.f32 %v189_v1, %v126_v0 }
  0xb0   :  { %v130_v3 = vsel %vm129_vm3, %v128_v2, 0.0 }
  0xb1   :  { %v131_v4 = vrot.slane %v130_v3, 4 }
  0xb3   :  { %v132_v5 = vadd.f32 %v131_v4, %v130_v3 }
  0xb5   :  { %v133_v6 = vrot.slane %v132_v5, 2 }
  0xb7   :  { %v134_v7 = vadd.f32 %v133_v6, %v132_v5 }
  0xb9   :  { %v135_v8 = vrot.slane %v134_v7, 1 }
  0xbb   :  { %v136_v10 = vadd.f32 %v135_v8, %v134_v7 }
  0xbd   :  { %v142_v11 = vadd.f32 %v140_v9, %v136_v10 }
  0xbf   :  { %143 = vst [vmem:[#allocation7] sm:$0x1] %v142_v11 }
  0xc0   :  { %154 = dma.vmem_to_hbm [thread:$0]  %s150_s1, 16, %s152_s21, [#allocation4]  }
  0xc1   :  { %266 = dma.done.wait [#allocation4], 16  }
  0xc2   :  { %267 = vsyncadd [#allocation4], 4294967280 }
  0xc3   :  { %159 = vsyncpa [#allocation3], 1 }
  0xc4   :  { %160 = vsyncpa [#allocation6], 1 }
  0xc5   :  { %161 = vsyncpa [#allocation4], 1 }

</bundles_post_ra>
